<compile_context>
chip_gen: v5e
topology: v5e:2x2
jax: 0.10.0
libtpu: 0.0.40
codegen_flags: <defaults>
</compile_context>

<pallas_src>
import numpy as np
import jax
import jax.numpy as jnp
from jax import lax
from jax.experimental import pallas as pl
from jax.experimental.pallas import tpu as pltpu

_LANE = 128
_SUB = 8
_MXU_TILE = 512   # output tile: feeds the 256x256 MXU on v6e/v7x (4 passes on v5e)
_K_TILE = 512

_VMEM_BUDGET = None


def _vmem_budget():
    """Per-pallas_call block budget in bytes, derived from the chip's VMEM."""
    global _VMEM_BUDGET
    if _VMEM_BUDGET is None:
        cap = 64 << 20
        try:
            cap = int(getattr(pltpu.get_tpu_info(), "vmem_capacity_bytes", cap)) or cap
        except Exception:
            pass
        # stay well under the ~32 MiB scoped default and v7x's 64 MiB physical VMEM
        _VMEM_BUDGET = max(4 << 20, min(16 << 20, cap // 4))
    return _VMEM_BUDGET


def _min_sublanes(dtype):
    # dtype-native sublane multiple: f32 -> 8, bf16 -> 16, int8/fp8 -> 32
    item = jnp.dtype(dtype).itemsize
    return {4: 8, 2: 16, 1: 32}.get(item, 8)


# ----------------------------------------------------------------------------
# Elementwise helpers
# ----------------------------------------------------------------------------
def _ew_view(a):
    """2-D lane view of `a`, copy-free whenever possible.

    Returns (view2d, orig_n): orig_n is None when no epilogue is needed, or the
    original element count when the rare padded fallback path was taken.
    """
    n = a.size
    flat = a.reshape(-1)
    if n % _LANE == 0:
        for cols in (1024, 512, 256, _LANE):
            if n % cols == 0:
                return flat.reshape(n // cols, cols), None
    # Ragged total size: keep the natural trailing dim as the lane axis
    # (block last dim == full extent -> masked stores, but no extra HBM pass).
    item = jnp.dtype(a.dtype).itemsize
    min_sub = _min_sublanes(a.dtype)
    if a.ndim >= 2:
        cols = a.shape[-1]
        if 6 * min_sub * (cols + _LANE) * item <= _vmem_budget():
            return a.reshape(-1, cols), None
    elif 6 * _SUB * (n + _LANE) * item <= _vmem_budget():
        return flat.reshape(1, n), None
    # Rare correctness fallback (huge ragged 1-D / huge ragged trailing dim):
    # pad to a lane multiple (one extra HBM pass).
    pad = (-n) % _LANE
    return jnp.pad(flat, (0, pad)).reshape(-1, _LANE), n


def _ew_block_rows(rows, cols, dtype):
    """Rows per block: ~VMEM_budget/6 per operand; >=2 blocks for medium tensors."""
    min_sub = _min_sublanes(dtype)
    item = jnp.dtype(dtype).itemsize
    per_op = _vmem_budget() // 6          # 3 arrays (x, y, out) x double buffering
    target = max(min_sub, (per_op // max(1, cols * item)) // min_sub * min_sub)
    if rows > 2 * min_sub:
        # keep at least 2 grid blocks so both v7x TensorCores get work
        half = -(-((rows + 1) // 2) // min_sub) * min_sub
        target = min(target, max(half, min_sub))
    return min(rows, target)


def _ew_call(kernel, operands, rows, cols, block_rows, dtype, smem_operands=()):
    in_specs = [pl.BlockSpec(memory_space=pltpu.MemorySpace.SMEM)
                for _ in smem_operands]
    in_specs += [pl.BlockSpec((block_rows, cols), lambda i: (i, 0))
                 for _ in operands]
    return pl.pallas_call(
        kernel,
        out_shape=jax.ShapeDtypeStruct((rows, cols), dtype),
        grid=(pl.cdiv(rows, block_rows),),
        in_specs=in_specs,
        out_specs=pl.BlockSpec((block_rows, cols), lambda i: (i, 0)),
        compiler_params=pltpu.CompilerParams(dimension_semantics=("parallel",)),
    )(*smem_operands, *operands)


def _tensor_scalar(op, x, s, out_shape):
    """op(x_tensor, s) with size-1 operand `s` broadcast on the VPU from SMEM."""
    dt = x.dtype
    if x.size == 0:
        return jnp.zeros(out_shape, dt)
    smem_dt = jnp.float32 if jnp.issubdtype(dt, jnp.floating) else jnp.int32
    s = s.reshape(-1)[:1].astype(smem_dt)
    x2, n_orig = _ew_view(x)
    rows, cols = x2.shape
    br = _ew_block_rows(rows, cols, dt)

    def kernel(s_ref, x_ref, o_ref):
        o_ref[...] = op(x_ref[...], s_ref[0].astype(dt))

    out = _ew_call(kernel, (x2,), rows, cols, br, dt, smem_operands=(s,))
    if n_orig is not None:
        out = out.reshape(-1)[:n_orig]
    return out.reshape(out_shape)


def _binary_ew(op, x, y):
    x = jnp.asarray(x)
    y = jnp.asarray(y)
    dt = jnp.result_type(x.dtype, y.dtype)
    out_shape = jnp.broadcast_shapes(x.shape, y.shape)
    if x.shape != y.shape:
        # size-1 operands broadcast inside the kernel via an SMEM scalar.
        if y.size == 1:
            return _tensor_scalar(op, x.astype(dt), y.astype(dt), out_shape)
        if x.size == 1:
            return _tensor_scalar(lambda t, s: op(s, t),
                                  y.astype(dt), x.astype(dt), out_shape)
        # TODO(synk): general (non size-1) broadcasting still materializes the
        # broadcast operands in HBM before the kernel boundary.
        x = jnp.broadcast_to(x, out_shape)
        y = jnp.broadcast_to(y, out_shape)
    x = x.astype(dt)
    y = y.astype(dt)
    if x.size == 0:
        return jnp.zeros(out_shape, dt)
    x2, n_orig = _ew_view(x)
    y2, _ = _ew_view(y)
    rows, cols = x2.shape
    br = _ew_block_rows(rows, cols, dt)

    def kernel(x_ref, y_ref, o_ref):
        o_ref[...] = op(x_ref[...], y_ref[...])

    out = _ew_call(kernel, (x2, y2), rows, cols, br, dt)
    if n_orig is not None:
        out = out.reshape(-1)[:n_orig]
    return out.reshape(out_shape)


def _scalar_ew(op, x, y):
    """op(x, y) with `y` a python number baked into the kernel as a constant."""
    x = jnp.asarray(x)
    if isinstance(y, bool):
        dt = x.dtype
    elif isinstance(y, float) and not jnp.issubdtype(x.dtype, jnp.floating):
        dt = jnp.float32          # torch: python float promotes integer tensors
    else:
        dt = x.dtype
    xb = x.astype(dt)
    if xb.size == 0:
        return jnp.zeros(x.shape, dt)
    x2, n_orig = _ew_view(xb)
    rows, cols = x2.shape
    br = _ew_block_rows(rows, cols, dt)

    def kernel(x_ref, o_ref):
        o_ref[...] = op(x_ref[...], jnp.asarray(y, dtype=dt))

    out = _ew_call(kernel, (x2,), rows, cols, br, dt)
    if n_orig is not None:
        out = out.reshape(-1)[:n_orig]
    return out.reshape(x.shape)


# ----------------------------------------------------------------------------
# cat
# ----------------------------------------------------------------------------
def _cat_last(parts, widths, dt):
    """Concat along the trailing (lane) axis of (B, w_i) views."""
    B = parts[0].shape[0]
    total_w = sum(widths)
    item = jnp.dtype(dt).itemsize
    min_sub = _min_sublanes(dt)
    budget = _vmem_budget()
    # per grid step (double-buffered): ~ 4 * b_blk * total_w * item bytes
    per_row = 4 * total_w * item
    if per_row * min(B, min_sub) > 2 * budget:
        # TODO(synk): extremely wide concats would need lane-axis tiling per
        # part; fall back to XLA concatenate to stay within VMEM.
        return jnp.concatenate(parts, axis=1)
    max_b = max(min_sub, (budget // per_row) // min_sub * min_sub)
    if B > 2 * min_sub:
        half = -(-((B + 1) // 2) // min_sub) * min_sub
        max_b = min(max_b, max(half, min_sub))
    b_blk = min(B, max_b)

    def kernel(*refs):
        *in_refs, out_ref = refs
        off = 0
        for r, w in zip(in_refs, widths):
            out_ref[:, off:off + w] = r[...]      # static-slice (masked) stores
            off += w

    return pl.pallas_call(
        kernel,
        out_shape=jax.ShapeDtypeStruct((B, total_w), dt),
        grid=(pl.cdiv(B, b_blk),),
        in_specs=[pl.BlockSpec((b_blk, w), lambda i: (i, 0)) for w in widths],
        out_specs=pl.BlockSpec((b_blk, total_w), lambda i: (i, 0)),
        compiler_params=pltpu.CompilerParams(dimension_semantics=("parallel",)),
    )(*parts)


def _cat_mid(parts, sizes, total, T, dt):
    """Concat along the middle axis of (B, s_i, T) views, T >= 128."""
    B = parts[0].shape[0]
    item = jnp.dtype(dt).itemsize
    budget = _vmem_budget()
    # per grid step (double-buffered): ~ 4 * total * t_blk * item bytes
    max_t = (budget // max(1, 4 * total * item)) // _LANE * _LANE
    if max_t < _LANE:
        # TODO(synk): very large concat extents would need per-part tiling of
        # the concat axis; fall back to XLA concatenate to stay within VMEM.
        return jnp.concatenate(parts, axis=1)
    t_blk = T if T <= max_t else max_t

    def kernel(*refs):
        *in_refs, out_ref = refs
        off = 0
        for r, s in zip(in_refs, sizes):
            out_ref[:, off:off + s, :] = r[...]
            off += s

    return pl.pallas_call(
        kernel,
        out_shape=jax.ShapeDtypeStruct((B, total, T), dt),
        grid=(B, pl.cdiv(T, t_blk)),
        in_specs=[pl.BlockSpec((1, s, t_blk), lambda b, t: (b, 0, t))
                  for s in sizes],
        out_specs=pl.BlockSpec((1, total, t_blk), lambda b, t: (b, 0, t)),
        compiler_params=pltpu.CompilerParams(
            dimension_semantics=("parallel", "parallel")),
    )(*parts)


def _cat(xs, dim):
    xs = [jnp.asarray(a) for a in xs]
    dt = xs[0].dtype if len(xs) == 1 else jnp.result_type(*[a.dtype for a in xs])
    xs = [a.astype(dt) for a in xs]
    nd = xs[0].ndim
    dim = dim % nd
    sizes = [int(a.shape[dim]) for a in xs]
    total = sum(sizes)
    out_shape = list(xs[0].shape)
    out_shape[dim] = total
    out_shape = tuple(out_shape)
    if int(np.prod(out_shape, dtype=np.int64)) == 0:
        return jnp.zeros(out_shape, dt)
    nz = [(a, s) for a, s in zip(xs, sizes) if s > 0]
    if len(nz) == 1:
        return nz[0][0].reshape(out_shape)
    xs = [a for a, _ in nz]
    sizes = [s for _, s in nz]

    before = int(np.prod(out_shape[:dim], dtype=np.int64))
    after = int(np.prod(out_shape[dim + 1:], dtype=np.int64))

    if dim == nd - 1 or after < _LANE:
        # A middle-axis concat is exactly a trailing-axis concat on
        # (before, s_i*after) views; folding keeps the output lane-dense.
        widths = [s * after for s in sizes]
        parts = [a.reshape(before, w) for a, w in zip(xs, widths)]
        return _cat_last(parts, widths, dt).reshape(out_shape)

    parts = [a.reshape(before, s, after) for a, s in zip(xs, sizes)]
    return _cat_mid(parts, sizes, total, after, dt).reshape(out_shape)


# ----------------------------------------------------------------------------
# matmul: tiled MXU matmul, f32 accumulator, no HBM padding
# ----------------------------------------------------------------------------
def _matmul(a, b):
    # TODO(synk): only 2-D torch.matmul is implemented (no batched / 1-D cases).
    assert a.ndim == 2 and b.ndim == 2, "only 2D matmul supported"
    M, K = a.shape
    K2, N = b.shape
    assert K == K2
    dt = jnp.result_type(a.dtype, b.dtype)
    a = a.astype(dt)
    b = b.astype(dt)
    # TODO(synk): integer matmul has no MXU datapath on newer TPUs; use XLA.
    if not jnp.issubdtype(dt, jnp.floating):
        return jnp.dot(a, b)
    # Small / narrow shapes: pallas_call + grid-step overhead and masked narrow
    # output tiles dominate; XLA's fused dot is strictly faster here.
    if ((M <= _MXU_TILE and N <= _MXU_TILE and K <= _K_TILE)
            or N < _LANE or K < _LANE or M < _SUB):
        return jnp.dot(a, b, precision=lax.Precision.HIGHEST)

    tm = min(_MXU_TILE, M)          # tile == full dim when the dim is small (legal)
    tn = min(_MXU_TILE, N)
    tk = min(_K_TILE, K)
    nk = pl.cdiv(K, tk)
    rem_k = K - (nk - 1) * tk       # valid K columns in the last k block

    def kernel(a_ref, b_ref, o_ref, acc_ref):
        k = pl.program_id(2)

        @pl.when(k == 0)
        def _():
            acc_ref[...] = jnp.zeros_like(acc_ref)

        a_blk = a_ref[...]
        b_blk = b_ref[...]
        if rem_k != tk:
            # Ragged K edge: zero the out-of-range K slice in-kernel instead of
            # padding A/B in HBM (saves a full extra read+write of each).
            valid = jnp.where(k == nk - 1, rem_k, tk)
            a_mask = lax.broadcasted_iota(jnp.int32, (1, tk), 1) < valid
            b_mask = lax.broadcasted_iota(jnp.int32, (tk, 1), 0) < valid
            a_blk = jnp.where(a_mask, a_blk, 0)
            b_blk = jnp.where(b_mask, b_blk, 0)
        acc_ref[...] += jnp.dot(a_blk, b_blk, preferred_element_type=jnp.float32)

        @pl.when(k == nk - 1)
        def _():
            o_ref[...] = acc_ref[...].astype(o_ref.dtype)

    # VMEM: A/B blocks 1 MiB x2 buffers each + out 1 MiB x2 + 1 MiB f32 acc
    # ~= 7 MiB for f32 512-tiles -> far under the 32 MiB scoped default.
    return pl.pallas_call(
        kernel,
        out_shape=jax.ShapeDtypeStruct((M, N), dt),
        grid=(pl.cdiv(M, tm), pl.cdiv(N, tn), nk),
        in_specs=[pl.BlockSpec((tm, tk), lambda i, j, k: (i, k)),
                  pl.BlockSpec((tk, tn), lambda i, j, k: (k, j))],
        out_specs=pl.BlockSpec((tm, tn), lambda i, j, k: (i, j)),
        scratch_shapes=[pltpu.VMEM((tm, tn), jnp.float32)],
        compiler_params=pltpu.CompilerParams(
            dimension_semantics=("parallel", "parallel", "arbitrary")),
    )(a, b)


# ----------------------------------------------------------------------------
# FloatFunctional equivalent
# ----------------------------------------------------------------------------
class FloatFunctional:
    """JAX/Pallas equivalent of torch.ao.nn.quantized.FloatFunctional.

    activation_post_process is nn.Identity() in the reference -> no-op here.
    """

    def forward(self, x):
        raise RuntimeError(
            "FloatFunctional is not intended to use the 'forward'. "
            "Please use the underlying operation")

    def add(self, x, y):
        return _binary_ew(jnp.add, x, y)

    def add_scalar(self, x, y):
        if isinstance(y, (int, float, bool)):
            return _scalar_ew(jnp.add, x, y)
        return _binary_ew(jnp.add, x, y)

    def mul(self, x, y):
        return _binary_ew(jnp.multiply, x, y)

    def mul_scalar(self, x, y):
        if isinstance(y, (int, float, bool)):
            return _scalar_ew(jnp.multiply, x, y)
        return _binary_ew(jnp.multiply, x, y)

    def add_relu(self, x, y):
        return _binary_ew(lambda a, b: jnp.maximum(a + b, 0), x, y)

    def cat(self, xs, dim=0):
        return _cat(list(xs), dim)

    def matmul(self, x, y):
        return _matmul(jnp.asarray(x), jnp.asarray(y))


if __name__ == "__main__":
    key = jax.random.PRNGKey(0)
    ks = jax.random.split(key, 8)
    # NCHW-shaped activations for the elementwise / cat ops.
    x = jax.random.normal(ks[0], (2, 4, 16, 16), jnp.float32)
    y = jax.random.normal(ks[1], (2, 4, 16, 16), jnp.float32)
    # matmul operands: tiny (XLA fast path), K-tiled, and edge-masked cases.
    a = jax.random.normal(ks[2], (8, 32), jnp.float32)
    b = jax.random.normal(ks[3], (32, 16), jnp.float32)
    a_big = jax.random.normal(ks[4], (128, 1024), jnp.float32)
    b_big = jax.random.normal(ks[5], (1024, 256), jnp.float32)
    a_edge = jax.random.normal(ks[6], (520, 600), jnp.float32)
    b_edge = jax.random.normal(ks[7], (600, 264), jnp.float32)

    ff = FloatFunctional()
    xn, yn = np.asarray(x), np.asarray(y)

    np.testing.assert_allclose(jax.block_until_ready(ff.add(x, y)),
                               xn + yn, rtol=1e-6, atol=1e-6)
    np.testing.assert_allclose(jax.block_until_ready(ff.mul(x, y)),
                               xn * yn, rtol=1e-6, atol=1e-6)
    np.testing.assert_allclose(jax.block_until_ready(ff.add_relu(x, y)),
                               np.maximum(xn + yn, 0.0), rtol=1e-6, atol=1e-6)
    np.testing.assert_allclose(jax.block_until_ready(ff.add_scalar(x, 1.5)),
                               xn + 1.5, rtol=1e-6, atol=1e-6)
    np.testing.assert_allclose(jax.block_until_ready(ff.mul_scalar(x, 0.75)),
                               xn * 0.75, rtol=1e-6, atol=1e-6)

    # size-1 tensor operand -> SMEM scalar path (broadcast inside the kernel).
    np.testing.assert_allclose(jax.block_until_ready(ff.add(x, jnp.float32(2.0))),
                               xn + 2.0, rtol=1e-6, atol=1e-6)

    # docstring example: add of two 0-d tensors.
    np.testing.assert_allclose(
        jax.block_until_ready(ff.add(jnp.float32(3.0), jnp.float32(4.0))), 7.0,
        rtol=1e-6, atol=1e-6)

    # broadcast-shape semantics: (4,) + (1, 1) -> (1, 4).
    v = jnp.arange(4, dtype=jnp.float32)
    out_b = jax.block_until_ready(ff.add(v, jnp.ones((1, 1), jnp.float32)))
    assert out_b.shape == (1, 4)
    np.testing.assert_allclose(out_b,
                               np.arange(4, dtype=np.float32)[None] + 1.0,
                               rtol=1e-6, atol=1e-6)

    for d in (0, 1, 2, -1):
        out_cat = jax.block_until_ready(ff.cat([x, y], dim=d))
        np.testing.assert_allclose(out_cat, np.concatenate([xn, yn], axis=d),
                                   rtol=0, atol=0)

    # small matmuls route to the XLA fast path (full f32 precision).
    np.testing.assert_allclose(jax.block_until_ready(ff.matmul(a, b)),
                               np.asarray(a) @ np.asarray(b),
                               rtol=1e-4, atol=1e-4)
    a_pad = jax.random.normal(ks[2], (300, 64), jnp.float32)
    b_pad = jax.random.normal(ks[3], (64, 48), jnp.float32)
    np.testing.assert_allclose(jax.block_until_ready(ff.matmul(a_pad, b_pad)),
                               np.asarray(a_pad) @ np.asarray(b_pad),
                               rtol=1e-4, atol=1e-4)

    # Pallas MXU path.  f32 MXU matmuls may use bf16 passes, so compare against
    # a float64 reference with tolerances that still catch any tiling /
    # edge-masking bug (those would produce O(1)+ errors).
    ref_big = np.asarray(a_big, np.float64) @ np.asarray(b_big, np.float64)
    np.testing.assert_allclose(jax.block_until_ready(ff.matmul(a_big, b_big)),
                               ref_big, rtol=2e-2, atol=2e-1)

    # ragged M (520 -> masked edge block), ragged K (600 -> in-kernel K mask),
    # non-128-multiple N (264, full-extent tile): exercises every edge path
    # without any HBM padding.
    ref_edge = np.asarray(a_edge, np.float64) @ np.asarray(b_edge, np.float64)
    np.testing.assert_allclose(jax.block_until_ready(ff.matmul(a_edge, b_edge)),
                               ref_edge, rtol=2e-2, atol=2e-1)

    print("KERNEL_OK")
</pallas_src>

<mosaic_0001>
module attributes {stable_mosaic.version = 11 : i64} {
  func.func @kernel(%arg0: i32, %arg1: memref<2x1024xf32, #tpu.memory_space<vmem>>, %arg2: memref<2x1024xf32, #tpu.memory_space<vmem>>, %arg3: memref<2x1024xf32, #tpu.memory_space<vmem>>) attributes {dimension_semantics = [#tpu.dimension_semantics<parallel>], iteration_bounds = array<i64: 1>, scalar_prefetch = 0 : i64, scratch_operands = 0 : i64, tpu.core_type = #tpu.core_type<tc>, window_params = [{transform_indices = @transform_0, window_bounds = array<i64: 2, 1024>}, {transform_indices = @transform_1, window_bounds = array<i64: 2, 1024>}, {transform_indices = @transform_2, window_bounds = array<i64: 2, 1024>}]} {
    %c0 = arith.constant 0 : index
    %c0_0 = arith.constant 0 : index
    %0 = vector.load %arg1[%c0, %c0_0] : memref<2x1024xf32, #tpu.memory_space<vmem>>, vector<2x1024xf32>
    %c0_1 = arith.constant 0 : index
    %c0_2 = arith.constant 0 : index
    %1 = vector.load %arg2[%c0_1, %c0_2] : memref<2x1024xf32, #tpu.memory_space<vmem>>, vector<2x1024xf32>
    %2 = arith.addf %0, %1 : vector<2x1024xf32>
    %c0_3 = arith.constant 0 : index
    %c0_4 = arith.constant 0 : index
    %3 = vector.load %arg3[%c0_3, %c0_4] : memref<2x1024xf32, #tpu.memory_space<vmem>>, vector<2x1024xf32>
    tpu.vector_store %arg3[%c0_3, %c0_4], %2 {strides = array<i32>} : memref<2x1024xf32, #tpu.memory_space<vmem>>, vector<2x1024xf32>,
    return
  }
  func.func @transform_0(%arg0: i32) -> (i32, i32) {
    %c0_i32 = arith.constant 0 : i32
    %c0_i32_0 = arith.constant 0 : i32
    return %arg0, %c0_i32 : i32, i32
  }
  func.func @transform_1(%arg0: i32) -> (i32, i32) {
    %c0_i32 = arith.constant 0 : i32
    %c0_i32_0 = arith.constant 0 : i32
    return %arg0, %c0_i32 : i32, i32
  }
  func.func @transform_2(%arg0: i32) -> (i32, i32) {
    %c0_i32 = arith.constant 0 : i32
    %c0_i32_0 = arith.constant 0 : i32
    return %arg0, %c0_i32 : i32, i32
  }
}

</mosaic_0001>

<bundles_post_ra>
// kernel: tpu_custom_call.1
= control target key start
LH: loop header
LB: loop body
LE: loop exit
PB: predicated region body
PF: predicated region fallthrough
CT: control target
= control target key end

     0   :  { %7 = vsyncpa [#allocation3], 0  ;;  %s174_s0 = inlined_call_operand.hbm [shape: f32[2,1024], index: 0, kind: input, shape index: {}]   ;;  %s175_s1 = inlined_call_operand.hbm [shape: f32[2,1024], index: 1, kind: input, shape index: {}]   ;;  %s176_s2 = inlined_call_operand.hbm [shape: f32[2,1024], index: 2, kind: output, shape index: {}]  }
   0x1   :  { %8 = vsyncpa [#allocation6], 0 }
   0x2   :  { %9 = vsyncpa [#allocation4], 0  ;;  %s15_s11 = sshll.u32 %s174_s0, 4  ;;  %s147_s12 = smov [#allocation2]   ;;  %s16_s11 = int_to_ptr.hbm [resolvable:$true] %s15_s11 }
   0x3   :  { %s17_s13 = sshll.u32 %s147_s12, 4  ;;  %s26_s16 = sshll.u32 %s175_s1, 4  ;;  %s18_s13 = int_to_ptr.vmem [resolvable:$true] %s17_s13  ;;  %s27_s16 = int_to_ptr.hbm [resolvable:$true] %s26_s16 }
   0x4   :  { %20 = dma.hbm_to_vmem [thread:$0]  %s16_s11, 256, %s18_s13, [#allocation3]  }
   0x5   :  { %s148_s17 = smov [#allocation5]  }
   0x6   :  { %s28_s18 = sshll.u32 %s148_s17, 4  ;;  %s29_s18 = int_to_ptr.vmem [resolvable:$true] %s28_s18 }
   0x7   :  { %31 = dma.hbm_to_vmem [thread:$0]  %s27_s16, 256, %s29_s18, [#allocation6]  }
   0x8   :  { %141 = dma.done.wait [#allocation3], 256  }
   0x9   :  { %142 = vsyncadd [#allocation3], 4294967040 }
   0xa   :  { %143 = dma.done.wait [#allocation6], 256  }
   0xb   :  { %144 = vsyncadd [#allocation6], 4294967040  ;;  %s149_s19 = smov [#allocation7]   ;;  %s55_s22 = sshll.u32 %s176_s2, 4  ;;  %v40_v0 = vld [vmem:[#allocation2] sm:$0xff]  ;;  %v42_v1 = vld [vmem:[#allocation5] sm:$0xff]  ;;  %s56_s22 = int_to_ptr.hbm [resolvable:$true] %s55_s22 }
   0xc   :  { %s53_s0 = sshll.u32 %s149_s19, 4  ;;  %v41_v2 = vld [vmem:[#allocation2 + $0x8] sm:$0xff]  ;;  %v44_v3 = vadd.f32 %v42_v1, %v40_v0  ;;  %v43_v4 = vld [vmem:[#allocation5 + $0x8] sm:$0xff]  ;;  %s54_s0 = int_to_ptr.vmem [resolvable:$true] %s53_s0 }
   0xd   :  { %v45_v5 = vadd.f32 %v43_v4, %v41_v2 }
   0xe   :  { %46 = vst [vmem:[#allocation7] sm:$0xff] %v44_v3 }
   0xf   :  { %47 = vst [vmem:[#allocation7 + $0x8] sm:$0xff] %v45_v5 }
  0x10   :  { %58 = dma.vmem_to_hbm [thread:$0]  %s54_s0, 256, %s56_s22, [#allocation4]  }
  0x11   :  { %145 = dma.done.wait [#allocation4], 256  }
  0x12   :  { %146 = vsyncadd [#allocation4], 4294967040 }
  0x13   :  { %63 = vsyncpa [#allocation3], 1 }
  0x14   :  { %64 = vsyncpa [#allocation6], 1 }
  0x15   :  { %65 = vsyncpa [#allocation4], 1 }

</bundles_post_ra>
